<compile_context>
chip_gen: v7x
topology: tpu7x:2x2x1
jax: 0.10.0
libtpu: 0.0.40
codegen_flags: <defaults>
</compile_context>

<pallas_src>
import functools

import numpy as np
import jax
import jax.numpy as jnp
from jax.experimental import pallas as pl
from jax.experimental.pallas import tpu as pltpu


def _round_up(x: int, m: int) -> int:
    return (x + m - 1) // m * m


def gaussian_window_1d(window_size: int, sigma: float) -> np.ndarray:
    # Matches torch: x = arange(ws).float() - ws // 2 ; g = exp(-0.5*(x/sigma)^2); g /= g.sum()
    x = np.arange(window_size, dtype=np.float32) - (window_size // 2)
    g = np.exp(-0.5 * np.square(x / np.float32(sigma))).astype(np.float32)
    return (g / g.sum(dtype=np.float32)).astype(np.float32)


def _band_matrices(h, w, h_a, w_a, window_size, sigma):
    """Banded matrices implementing the zero-padded separable 'same' Gaussian
    conv directly on the (alignment-padded) unpadded image:

        hbuf = x  @ Bw      horizontal pass  (contract over W)
        out  = Bh @ hbuf    vertical pass    (contract over H)

    Band columns/rows for output positions >= w / >= h are zero, so the
    alignment-padded region of the output is exactly zero.
    """
    g = gaussian_window_1d(window_size, sigma)
    pad = window_size // 2

    bw = np.zeros((w_a, w_a), np.float32)
    for wc in range(w):
        for j in range(window_size):
            r = wc + j - pad
            if 0 <= r < w:
                bw[r, wc] += g[j]

    bh = np.zeros((h_a, h_a), np.float32)
    for hc in range(h):
        for i in range(window_size):
            r = hc + i - pad
            if 0 <= r < h:
                bh[hc, r] += g[i]

    return bh, bw


def _ssim_kernel(bh_ref, bw_ref, x1_ref, x2_ref, out_ref, *, b, h, w, h_a, w_a):
    """Per-sample sum of the SSIM map for a block of `b` samples.

    bh_ref : (b*h_a, b*h_a)  block-diagonal vertical band matrix (VMEM)
    bw_ref : (w_a, w_a)      horizontal band matrix              (VMEM)
    x1_ref, x2_ref : (b, h_a, w_a)  samples, lane-aligned        (VMEM)
    out_ref : (b, 1, 1)  per-sample sum of ssim_map over the valid h x w region
    """
    m = b * h_a
    x1 = x1_ref[...].reshape(m, w_a)
    x2 = x2_ref[...].reshape(m, w_a)
    bw = bw_ref[...]
    bh_blk = bh_ref[...]

    # ---- fused horizontal Gaussian pass: 5 quantities stacked along sublanes.
    stack = jnp.concatenate([x1, x2, x1 * x1, x2 * x2, x1 * x2], axis=0)  # (5m, w_a)
    hbuf = jnp.dot(stack, bw, preferred_element_type=jnp.float32)         # (5m, w_a)

    # ---- vertical pass: one matmul per quantity; the block-diagonal band
    # matrix keeps samples independent while M = K = b*h_a fills the MXU rows.
    def vpass(q):
        return jnp.dot(bh_blk, hbuf[q * m:(q + 1) * m, :],
                       preferred_element_type=jnp.float32)                # (m, w_a)

    mu1 = vpass(0)
    mu2 = vpass(1)
    e11 = vpass(2)
    e22 = vpass(3)
    e12 = vpass(4)

    mu1_sq = mu1 * mu1
    mu2_sq = mu2 * mu2
    mu1_mu2 = mu1 * mu2
    sigma1_sq = e11 - mu1_sq
    sigma2_sq = e22 - mu2_sq
    sigma12 = e12 - mu1_mu2

    c1 = jnp.float32(0.01 ** 2)
    c2 = jnp.float32(0.03 ** 2)
    num = (2.0 * mu1_mu2 + c1) * (2.0 * sigma12 + c2)
    den = (mu1_sq + mu2_sq + c1) * (sigma1_sq + sigma2_sq + c2)

    # den > 0 always; EUP reciprocal + one Newton step (two free VPU ops).
    r = pl.reciprocal(den, approx=True)
    r = r * (2.0 - den * r)
    ssim_map = (num * r).reshape(b, h_a, w_a)

    if h != h_a or w != w_a:
        # Alignment-padded positions have mu = sigma = 0 -> ssim == 1 there;
        # they must NOT be counted in the sum.
        rows = jax.lax.broadcasted_iota(jnp.int32, (b, h_a, w_a), 1)
        cols = jax.lax.broadcasted_iota(jnp.int32, (b, h_a, w_a), 2)
        ssim_map = jnp.where((rows < h) & (cols < w), ssim_map, 0.0)

    s = jnp.sum(ssim_map, axis=2, keepdims=True)        # (b, h_a, 1)
    out_ref[...] = jnp.sum(s, axis=1, keepdims=True)    # (b, 1, 1)


def _vmem_estimate(b, h_a, w_a):
    img_block = 4 * b * h_a * w_a
    io = 2 * 2 * img_block                              # 2 inputs, double-buffered
    tmps = 16 * img_block                               # stack + hbuf + conv + ssim temps
    bands = 2 * 4 * ((b * h_a) ** 2 + w_a * w_a)        # band matrices (double-buffered)
    return io + tmps + bands


def ssim_loss(img1, img2, *, window_size=11, sigma=1.5, size_average=True):
    """Pallas implementation of SSIM.forward (returns 1 - mean(ssim_map))."""
    assert img1.shape == img2.shape
    n, c, h, w = img1.shape
    assert c == 1, "module hard-codes a single-channel (1,1,ws,ws) window (groups=1)"

    h_a = _round_up(h, 8)      # sublane alignment
    w_a = _round_up(w, 128)    # lane alignment

    # VMEM capacity (generation-aware: v7x has 64 MiB/TC, v5e/v6e 128 MiB).
    try:
        vmem_cap = int(pltpu.get_tpu_info().vmem_capacity_bytes)
    except Exception:  # pragma: no cover - conservative fallback
        vmem_cap = 64 << 20

    # Batch block: aim for B*h_a >= 256 MXU rows, shrink to fit the VMEM budget.
    b = max(1, min(n, -(-256 // h_a)))
    budget = int(0.6 * vmem_cap)
    while b > 1 and _vmem_estimate(b, h_a, w_a) > budget:
        b -= 1
    est = _vmem_estimate(b, h_a, w_a)
    vmem_limit = int(min(max(2 * est, 32 << 20), int(0.85 * vmem_cap)))

    n_pad = -(-n // b) * b

    bh_np, bw_np = _band_matrices(h, w, h_a, w_a, window_size, sigma)
    bh_blk = jnp.asarray(np.kron(np.eye(b, dtype=np.float32), bh_np))   # (b*h_a, b*h_a)
    bw = jnp.asarray(bw_np)                                             # (w_a, w_a)

    x1 = jnp.asarray(img1, jnp.float32)[:, 0]   # (N, H, W)
    x2 = jnp.asarray(img2, jnp.float32)[:, 0]
    pad_cfg = ((0, n_pad - n), (0, h_a - h), (0, w_a - w))
    if any(p for _, p in pad_cfg):
        x1 = jnp.pad(x1, pad_cfg)
        x2 = jnp.pad(x2, pad_cfg)

    kernel = functools.partial(_ssim_kernel, b=b, h=h, w=w, h_a=h_a, w_a=w_a)

    per_sample = pl.pallas_call(
        kernel,
        out_shape=jax.ShapeDtypeStruct((n_pad, 1, 1), jnp.float32),
        grid=(n_pad // b,),
        in_specs=[
            pl.BlockSpec((b * h_a, b * h_a), lambda i: (0, 0)),   # Bh (block-diag, constant)
            pl.BlockSpec((w_a, w_a), lambda i: (0, 0)),           # Bw (constant)
            pl.BlockSpec((b, h_a, w_a), lambda i: (i, 0, 0)),     # img1 block i
            pl.BlockSpec((b, h_a, w_a), lambda i: (i, 0, 0)),     # img2 block i
        ],
        out_specs=pl.BlockSpec((b, 1, 1), lambda i: (i, 0, 0)),
        compiler_params=pltpu.CompilerParams(
            dimension_semantics=("parallel",),
            vmem_limit_bytes=vmem_limit,
        ),
    )(bh_blk, bw, x1, x2)

    sums = per_sample[:n, 0, 0]                     # (N,) per-sample ssim-map sums
    if size_average:
        # mean over N*C*H*W elements (C == 1)
        return 1.0 - jnp.sum(sums) / jnp.float32(n * h * w)
    else:
        # mean over dims [1, 2, 3] -> per-sample losses (N,)
        return 1.0 - sums / jnp.float32(h * w)


def _ssim_reference(img1, img2, window_size=11, sigma=1.5, size_average=True):
    """Pure-JAX/XLA reference matching the PyTorch module (for validation)."""
    g = jnp.asarray(gaussian_window_1d(window_size, sigma))
    w2d = jnp.outer(g, g)[None, None, :, :]
    pad = window_size // 2
    x1 = jnp.asarray(img1, jnp.float32)
    x2 = jnp.asarray(img2, jnp.float32)

    def conv(x):
        return jax.lax.conv_general_dilated(
            x, w2d, (1, 1), [(pad, pad), (pad, pad)],
            dimension_numbers=("NCHW", "OIHW", "NCHW"),
            precision=jax.lax.Precision.HIGHEST)

    mu1, mu2 = conv(x1), conv(x2)
    mu1_sq, mu2_sq, mu1_mu2 = mu1 * mu1, mu2 * mu2, mu1 * mu2
    s1 = conv(x1 * x1) - mu1_sq
    s2 = conv(x2 * x2) - mu2_sq
    s12 = conv(x1 * x2) - mu1_mu2
    c1, c2 = 0.01 ** 2, 0.03 ** 2
    m = ((2 * mu1_mu2 + c1) * (2 * s12 + c2)) / ((mu1_sq + mu2_sq + c1) * (s1 + s2 + c2))
    if size_average:
        return 1.0 - m.mean()
    return 1.0 - m.mean(axis=(1, 2, 3))


if __name__ == "__main__":
    key = jax.random.PRNGKey(0)
    k1, k2 = jax.random.split(key)
    img1 = jax.random.uniform(k1, (2, 1, 16, 16), dtype=jnp.float32)
    img2 = jnp.clip(
        img1 + 0.05 * jax.random.normal(k2, (2, 1, 16, 16), dtype=jnp.float32), 0.0, 1.0)

    loss = ssim_loss(img1, img2)                                    # scalar
    loss_per_sample = ssim_loss(img1, img2, size_average=False)     # (N,)
    jax.block_until_ready(loss)
    jax.block_until_ready(loss_per_sample)

    ref = _ssim_reference(img1, img2)
    ref_ps = _ssim_reference(img1, img2, size_average=False)

    assert loss.shape == () and loss_per_sample.shape == (2,)
    assert bool(jnp.isfinite(loss))
    # Newton-refined reciprocal -> per-pixel error ~1e-6; tolerance left with
    # margin for MXU f32-emulation rounding.  Structural bugs would be O(0.1+).
    assert bool(jnp.allclose(loss, ref, atol=1e-2, rtol=1e-2)), (loss, ref)
    assert bool(jnp.allclose(loss_per_sample, ref_ps, atol=1e-2, rtol=1e-2)), (
        loss_per_sample, ref_ps)
    print("KERNEL_OK")
</pallas_src>

<mosaic_0001>
module attributes {stable_mosaic.version = 11 : i64} {
  func.func @_ssim_kernel(%arg0: i32, %arg1: memref<32x32xf32, #tpu.memory_space<vmem>>, %arg2: memref<128x128xf32, #tpu.memory_space<vmem>>, %arg3: memref<2x16x128xf32, #tpu.memory_space<vmem>>, %arg4: memref<2x16x128xf32, #tpu.memory_space<vmem>>, %arg5: memref<2x1x1xf32, #tpu.memory_space<vmem>>) attributes {dimension_semantics = [#tpu.dimension_semantics<parallel>], iteration_bounds = array<i64: 1>, scalar_prefetch = 0 : i64, scratch_operands = 0 : i64, tpu.core_type = #tpu.core_type<tc>, window_params = [{pipeline_mode = #tpu.pipeline_mode<synchronous>, transform_indices = @transform_0, window_bounds = array<i64: 32, 32>}, {pipeline_mode = #tpu.pipeline_mode<synchronous>, transform_indices = @transform_1, window_bounds = array<i64: 128, 128>}, {transform_indices = @transform_2, window_bounds = array<i64: 2, 16, 128>}, {transform_indices = @transform_3, window_bounds = array<i64: 2, 16, 128>}, {transform_indices = @transform_4, window_bounds = array<i64: 2, 1, 1>}]} {
    %c0 = arith.constant 0 : index
    %c0_0 = arith.constant 0 : index
    %c0_1 = arith.constant 0 : index
    %0 = vector.load %arg3[%c0, %c0_0, %c0_1] : memref<2x16x128xf32, #tpu.memory_space<vmem>>, vector<2x16x128xf32>
    %1 = vector.shape_cast %0 : vector<2x16x128xf32> to vector<32x128xf32>
    %c0_2 = arith.constant 0 : index
    %c0_3 = arith.constant 0 : index
    %c0_4 = arith.constant 0 : index
    %2 = vector.load %arg4[%c0_2, %c0_3, %c0_4] : memref<2x16x128xf32, #tpu.memory_space<vmem>>, vector<2x16x128xf32>
    %3 = vector.shape_cast %2 : vector<2x16x128xf32> to vector<32x128xf32>
    %c0_5 = arith.constant 0 : index
    %c0_6 = arith.constant 0 : index
    %4 = vector.load %arg2[%c0_5, %c0_6] : memref<128x128xf32, #tpu.memory_space<vmem>>, vector<128x128xf32>
    %c0_7 = arith.constant 0 : index
    %c0_8 = arith.constant 0 : index
    %5 = vector.load %arg1[%c0_7, %c0_8] : memref<32x32xf32, #tpu.memory_space<vmem>>, vector<32x32xf32>
    %6 = arith.mulf %1, %1 : vector<32x128xf32>
    %7 = arith.mulf %3, %3 : vector<32x128xf32>
    %8 = arith.mulf %1, %3 : vector<32x128xf32>
    %9 = tpu.concatenate %1, %3, %6, %7, %8 in 0 : vector<32x128xf32>, vector<32x128xf32>, vector<32x128xf32>, vector<32x128xf32>, vector<32x128xf32> -> vector<160x128xf32>
    %cst = arith.constant dense<0.000000e+00> : vector<160x128xf32>
    %10 = tpu.matmul %9, %4, %cst {dimension_numbers = #tpu.dot_dimension_numbers<[1], [0], [0], [1], [0, 0, 1, 1], [], []>} : vector<160x128xf32>, vector<128x128xf32>, vector<160x128xf32> -> vector<160x128xf32>
    %11 = vector.extract_strided_slice %10 {offsets = [0, 0], sizes = [32, 128], strides = [1, 1]} : vector<160x128xf32> to vector<32x128xf32>
    %cst_9 = arith.constant dense<0.000000e+00> : vector<32x128xf32>
    %12 = tpu.matmul %5, %11, %cst_9 {dimension_numbers = #tpu.dot_dimension_numbers<[1], [0], [0], [1], [0, 0, 1, 1], [], []>} : vector<32x32xf32>, vector<32x128xf32>, vector<32x128xf32> -> vector<32x128xf32>
    %13 = vector.extract_strided_slice %10 {offsets = [32, 0], sizes = [32, 128], strides = [1, 1]} : vector<160x128xf32> to vector<32x128xf32>
    %cst_10 = arith.constant dense<0.000000e+00> : vector<32x128xf32>
    %14 = tpu.matmul %5, %13, %cst_10 {dimension_numbers = #tpu.dot_dimension_numbers<[1], [0], [0], [1], [0, 0, 1, 1], [], []>} : vector<32x32xf32>, vector<32x128xf32>, vector<32x128xf32> -> vector<32x128xf32>
    %15 = vector.extract_strided_slice %10 {offsets = [64, 0], sizes = [32, 128], strides = [1, 1]} : vector<160x128xf32> to vector<32x128xf32>
    %cst_11 = arith.constant dense<0.000000e+00> : vector<32x128xf32>
    %16 = tpu.matmul %5, %15, %cst_11 {dimension_numbers = #tpu.dot_dimension_numbers<[1], [0], [0], [1], [0, 0, 1, 1], [], []>} : vector<32x32xf32>, vector<32x128xf32>, vector<32x128xf32> -> vector<32x128xf32>
    %17 = vector.extract_strided_slice %10 {offsets = [96, 0], sizes = [32, 128], strides = [1, 1]} : vector<160x128xf32> to vector<32x128xf32>
    %cst_12 = arith.constant dense<0.000000e+00> : vector<32x128xf32>
    %18 = tpu.matmul %5, %17, %cst_12 {dimension_numbers = #tpu.dot_dimension_numbers<[1], [0], [0], [1], [0, 0, 1, 1], [], []>} : vector<32x32xf32>, vector<32x128xf32>, vector<32x128xf32> -> vector<32x128xf32>
    %19 = vector.extract_strided_slice %10 {offsets = [128, 0], sizes = [32, 128], strides = [1, 1]} : vector<160x128xf32> to vector<32x128xf32>
    %cst_13 = arith.constant dense<0.000000e+00> : vector<32x128xf32>
    %20 = tpu.matmul %5, %19, %cst_13 {dimension_numbers = #tpu.dot_dimension_numbers<[1], [0], [0], [1], [0, 0, 1, 1], [], []>} : vector<32x32xf32>, vector<32x128xf32>, vector<32x128xf32> -> vector<32x128xf32>
    %21 = arith.mulf %12, %12 : vector<32x128xf32>
    %22 = arith.mulf %14, %14 : vector<32x128xf32>
    %23 = arith.mulf %12, %14 : vector<32x128xf32>
    %24 = arith.subf %16, %21 : vector<32x128xf32>
    %25 = arith.subf %18, %22 : vector<32x128xf32>
    %26 = arith.subf %20, %23 : vector<32x128xf32>
    %cst_14 = arith.constant 2.000000e+00 : f32
    %27 = vector.broadcast %cst_14 : f32 to vector<32x128xf32>
    %28 = arith.mulf %27, %23 : vector<32x128xf32>
    %cst_15 = arith.constant 9.99999974E-5 : f32
    %29 = vector.broadcast %cst_15 : f32 to vector<32x128xf32>
    %30 = arith.addf %28, %29 : vector<32x128xf32>
    %cst_16 = arith.constant 2.000000e+00 : f32
    %31 = vector.broadcast %cst_16 : f32 to vector<32x128xf32>
    %32 = arith.mulf %31, %26 : vector<32x128xf32>
    %cst_17 = arith.constant 8.99999984E-4 : f32
    %33 = vector.broadcast %cst_17 : f32 to vector<32x128xf32>
    %34 = arith.addf %32, %33 : vector<32x128xf32>
    %35 = arith.mulf %30, %34 : vector<32x128xf32>
    %36 = arith.addf %21, %22 : vector<32x128xf32>
    %cst_18 = arith.constant 9.99999974E-5 : f32
    %37 = vector.broadcast %cst_18 : f32 to vector<32x128xf32>
    %38 = arith.addf %36, %37 : vector<32x128xf32>
    %39 = arith.addf %24, %25 : vector<32x128xf32>
    %cst_19 = arith.constant 8.99999984E-4 : f32
    %40 = vector.broadcast %cst_19 : f32 to vector<32x128xf32>
    %41 = arith.addf %39, %40 : vector<32x128xf32>
    %42 = arith.mulf %38, %41 : vector<32x128xf32>
    %43 = tpu.reciprocal %42 {approx = true} : vector<32x128xf32> -> vector<32x128xf32>
    %44 = arith.mulf %42, %43 : vector<32x128xf32>
    %cst_20 = arith.constant 2.000000e+00 : f32
    %45 = vector.broadcast %cst_20 : f32 to vector<32x128xf32>
    %46 = arith.subf %45, %44 : vector<32x128xf32>
    %47 = arith.mulf %43, %46 : vector<32x128xf32>
    %48 = arith.mulf %35, %47 : vector<32x128xf32>
    %49 = vector.shape_cast %48 : vector<32x128xf32> to vector<2x16x128xf32>
    %50 = tpu.iota {dimensions = array<i32: 1>} : vector<2x16x128xi32>
    %51 = tpu.iota {dimensions = array<i32: 2>} : vector<2x16x128xi32>
    %c16_i32 = arith.constant 16 : i32
    %52 = vector.broadcast %c16_i32 : i32 to vector<2x16x128xi32>
    %53 = arith.cmpi slt, %50, %52 : vector<2x16x128xi32>
    %c16_i32_21 = arith.constant 16 : i32
    %54 = vector.broadcast %c16_i32_21 : i32 to vector<2x16x128xi32>
    %55 = arith.cmpi slt, %51, %54 : vector<2x16x128xi32>
    %56 = arith.andi %53, %55 : vector<2x16x128xi1>
    %cst_22 = arith.constant 0.000000e+00 : f32
    %57 = vector.broadcast %cst_22 : f32 to vector<2x16x128xf32>
    %58 = arith.select %56, %49, %57 : vector<2x16x128xi1>, vector<2x16x128xf32>
    %cst_23 = arith.constant dense<0.000000e+00> : vector<2x16xf32>
    %59 = vector.multi_reduction <add>, %58, %cst_23 [2] : vector<2x16x128xf32> to vector<2x16xf32>
    %60 = vector.shape_cast %59 : vector<2x16xf32> to vector<2x16x1xf32>
    %cst_24 = arith.constant dense<0.000000e+00> : vector<2x1xf32>
    %61 = vector.multi_reduction <add>, %60, %cst_24 [1] : vector<2x16x1xf32> to vector<2x1xf32>
    %62 = vector.shape_cast %61 : vector<2x1xf32> to vector<2x1x1xf32>
    %c0_25 = arith.constant 0 : index
    %c0_26 = arith.constant 0 : index
    %c0_27 = arith.constant 0 : index
    %63 = vector.load %arg5[%c0_25, %c0_26, %c0_27] : memref<2x1x1xf32, #tpu.memory_space<vmem>>, vector<2x1x1xf32>
    tpu.vector_store %arg5[%c0_25, %c0_26, %c0_27], %62 {strides = array<i32>} : memref<2x1x1xf32, #tpu.memory_space<vmem>>, vector<2x1x1xf32>,
    return
  }
  func.func @transform_0(%arg0: i32) -> (i32, i32) {
    %c0_i32 = arith.constant 0 : i32
    %c0_i32_0 = arith.constant 0 : i32
    %c0_i32_1 = arith.constant 0 : i32
    return %c0_i32, %c0_i32_0 : i32, i32
  }
  func.func @transform_1(%arg0: i32) -> (i32, i32) {
    %c0_i32 = arith.constant 0 : i32
    %c0_i32_0 = arith.constant 0 : i32
    %c0_i32_1 = arith.constant 0 : i32
    return %c0_i32, %c0_i32_0 : i32, i32
  }
  func.func @transform_2(%arg0: i32) -> (i32, i32, i32) {
    %c0_i32 = arith.constant 0 : i32
    %c0_i32_0 = arith.constant 0 : i32
    %c0_i32_1 = arith.constant 0 : i32
    return %arg0, %c0_i32, %c0_i32_0 : i32, i32, i32
  }
  func.func @transform_3(%arg0: i32) -> (i32, i32, i32) {
    %c0_i32 = arith.constant 0 : i32
    %c0_i32_0 = arith.constant 0 : i32
    %c0_i32_1 = arith.constant 0 : i32
    return %arg0, %c0_i32, %c0_i32_0 : i32, i32, i32
  }
  func.func @transform_4(%arg0: i32) -> (i32, i32, i32) {
    %c0_i32 = arith.constant 0 : i32
    %c0_i32_0 = arith.constant 0 : i32
    %c0_i32_1 = arith.constant 0 : i32
    return %arg0, %c0_i32, %c0_i32_0 : i32, i32, i32
  }
}

</mosaic_0001>

<bundles_post_ra>
// kernel: tpu_custom_call.1
= control target key start
LH: loop header
LB: loop body
LE: loop exit
PB: predicated region body
PF: predicated region fallthrough
CT: control target
= control target key end

     0   :  { %9 = vsyncpa [#allocation3], 0  ;;  %s1391_s0 = inlined_call_operand.hbm [shape: f32[32,32], index: 0, kind: input, shape index: {}]   ;;  %s1392_s1 = inlined_call_operand.hbm [shape: f32[128,128], index: 1, kind: input, shape index: {}]   ;;  %s1393_s2 = inlined_call_operand.hbm [shape: f32[2,16,128], index: 2, kind: input, shape index: {}]   ;;  %s1394_s3 = inlined_call_operand.hbm [shape: f32[2,16,128], index: 3, kind: input, shape index: {}]   ;;  %s1395_s4 = inlined_call_operand.vmem [shape: f32[2,1,1], index: 4, kind: output, shape index: {}]  }
   0x1   :  { %10 = vsyncpa [#allocation5], 0 }
   0x2   :  { %11 = vsyncpa [#allocation8], 0  ;;  %s1253_s15 = smov [#allocation4]   ;;  %s1254_s17 = smov [#allocation2]  }
   0x3   :  { %s29_s16 = sshll.u32 %s1253_s15, 4  ;;  %s17_s18 = sshll.u32 %s1254_s17, 4  ;;  %s30_s16 = int_to_ptr.vmem [resolvable:$true] %s29_s16  ;;  %s1284_s18 = int_to_ptr.vmem [resolvable:$true] %s17_s18 }
   0x4   :  { %s1159_s21 = scalar_lea.hbm %s1392_s1, 2048 }
   0x5   :  { %p1160_p0 = scmp.ne.s32.totalorder %s1392_s1, %s1159_s21  ;;  %p1163_p1 = scmp.lt.u32.totalorder %s1159_s21, %s1392_s1 }
   0x7   :  { %p1165_p2 = pnand %p1163_p1, %p1160_p0 }
   0x9   :  { %1168 = shalt.err (!%p1165_p2)
}
   0xa   :  { %s1169_s26 = scalar_lea.vmem %s30_s16, 2048  ;;  %p1174_p4 = scmp.lt.s32.totalorder %s30_s16, %s30_s16 }
   0xb   :  { %p1170_p3 = scmp.ne.s32.totalorder %s30_s16, %s1169_s26  ;;  %p1175_p5 = scmp.lt.s32.totalorder %s1169_s26, %s1169_s26 }
   0xd   :  { %p1176_p6 = por %p1175_p5, %p1174_p4 }
   0xf   :  { %p1177_p7 = pnand %p1176_p6, %p1170_p3 }
  0x11   :  { %1180 = shalt.err (!%p1177_p7)
}
  0x12   :  { %s1255_s27 = smov 128   ;;  %s1256_s28 = smov 8  }
  0x13   :  { %35 = dma.hbm_to_vmem [thread:$0]  %s1392_s1, 2048, %s30_s16, [#allocation5], %s1255_s27, %s1255_s27, %s1256_s28  }
  0x14   :  { %s1181_s7 = scalar_lea.hbm %s1391_s0, 512 }
  0x15   :  { %p1182_p8 = scmp.ne.s32.totalorder %s1391_s0, %s1181_s7  ;;  %p1185_p9 = scmp.lt.u32.totalorder %s1181_s7, %s1391_s0 }
  0x17   :  { %p1187_p10 = pnand %p1185_p9, %p1182_p8 }
  0x19   :  { %1190 = shalt.err (!%p1187_p10)
}
  0x1a   :  { %s1191_s12 = scalar_lea.vmem %s1284_s18, 512  ;;  %p1196_p12 = scmp.lt.s32.totalorder %s1284_s18, %s1284_s18 }
  0x1b   :  { %p1192_p11 = scmp.ne.s32.totalorder %s1284_s18, %s1191_s12  ;;  %p1197_p13 = scmp.lt.s32.totalorder %s1191_s12, %s1191_s12 }
  0x1d   :  { %p1198_p0 = por %p1197_p13, %p1196_p12 }
  0x1f   :  { %p1199_p1 = pnand %p1198_p0, %p1192_p11 }
  0x21   :  { %1202 = shalt.err (!%p1199_p1)
}
  0x22   :  { %23 = dma.hbm_to_vmem [thread:$0]  %s1391_s0, 512, %s1284_s18, [#allocation3], %s1255_s27, %s1255_s27, %s1256_s28  }
  0x23   :  { %s1257_s14 = smov [#allocation6]   ;;  %s1258_s16 = smov [#allocation7]  }
  0x24   :  { %s41_s15 = sshll.u32 %s1257_s14, 4  ;;  %s53_s17 = sshll.u32 %s1258_s16, 4  ;;  %s42_s15 = int_to_ptr.vmem [resolvable:$true] %s41_s15  ;;  %s1321_s17 = int_to_ptr.vmem [resolvable:$true] %s53_s17 }
  0x25   :  { %s1203_s21 = scalar_lea.hbm %s1393_s2, 512 }
  0x26   :  { %p1204_p2 = scmp.ne.s32.totalorder %s1393_s2, %s1203_s21  ;;  %p1207_p3 = scmp.lt.u32.totalorder %s1203_s21, %s1393_s2 }
  0x28   :  { %p1209_p4 = pnand %p1207_p3, %p1204_p2 }
  0x2a   :  { %1212 = shalt.err (!%p1209_p4)
}
  0x2b   :  { %s1213_s0 = scalar_lea.vmem %s42_s15, 512  ;;  %p1218_p6 = scmp.lt.s32.totalorder %s42_s15, %s42_s15 }
  0x2c   :  { %p1214_p5 = scmp.ne.s32.totalorder %s42_s15, %s1213_s0  ;;  %p1219_p7 = scmp.lt.s32.totalorder %s1213_s0, %s1213_s0 }
  0x2e   :  { %p1220_p8 = por %p1219_p7, %p1218_p6 }
  0x30   :  { %p1221_p9 = pnand %p1220_p8, %p1214_p5 }
  0x32   :  { %1224 = shalt.err (!%p1221_p9)
}
  0x33   :  { %47 = dma.hbm_to_vmem [thread:$0]  %s1393_s2, 512, %s42_s15, [#allocation5], %s1255_s27, %s1255_s27, %s1256_s28  }
  0x34   :  { %s1225_s5 = scalar_lea.hbm %s1394_s3, 512 }
  0x35   :  { %p1226_p10 = scmp.ne.s32.totalorder %s1394_s3, %s1225_s5  ;;  %p1229_p11 = scmp.lt.u32.totalorder %s1225_s5, %s1394_s3 }
  0x37   :  { %p1231_p12 = pnand %p1229_p11, %p1226_p10 }
  0x39   :  { %1234 = shalt.err (!%p1231_p12)
}
  0x3a   :  { %s1235_s10 = scalar_lea.vmem %s1321_s17, 512  ;;  %p1240_p0 = scmp.lt.s32.totalorder %s1321_s17, %s1321_s17 }
  0x3b   :  { %p1236_p13 = scmp.ne.s32.totalorder %s1321_s17, %s1235_s10  ;;  %p1241_p1 = scmp.lt.s32.totalorder %s1235_s10, %s1235_s10 }
  0x3d   :  { %p1242_p2 = por %p1241_p1, %p1240_p0 }
  0x3f   :  { %p1243_p3 = pnand %p1242_p2, %p1236_p13 }
  0x41   :  { %1246 = shalt.err (!%p1243_p3)
}
  0x42   :  { %59 = dma.hbm_to_vmem [thread:$0]  %s1394_s3, 512, %s1321_s17, [#allocation8], %s1255_s27, %s1255_s27, %s1256_s28  }
  0x43   :  { %1247 = dma.done.wait [#allocation3], 512  }
  0x44   :  { %1248 = vsyncadd [#allocation3], 4294966784 }
  0x45   :  { %1249 = dma.done.wait [#allocation5], 2560  }
  0x46   :  { %1250 = vsyncadd [#allocation5], 4294964736 }
  0x47   :  { %1251 = dma.done.wait [#allocation8], 512  }
  0x48   :  { %1252 = vsyncadd [#allocation8], 4294966784  ;;  %v80_v0 = vld [vmem:[#allocation4] sm:$0xff]  ;;  %v81_v1 = vld [vmem:[#allocation4 + $0x8] sm:$0xff]  ;;  %vm277_vm0 = vcmask 261120   ;;  %vm835_vm2 = vcmask 0  }
  0x49   :  { %v82_v2 = vld [vmem:[#allocation4 + $0x10] sm:$0xff]  ;;  %v1073_v3 = vpack.c.bf16 %v81_v1, %v80_v0  ;;  %v83_v4 = vld [vmem:[#allocation4 + $0x18] sm:$0xff]  ;;  %v84_v6 = vld [vmem:[#allocation4 + $0x20] sm:$0xff] }
  0x4a   :  { %v1077_v5 = vpack.c.bf16 %v83_v4, %v82_v2  ;;  %v85_v7 = vld [vmem:[#allocation4 + $0x28] sm:$0xff]  ;;  %v72_v9 = vld [vmem:[#allocation6] sm:$0xff]  ;;  %v86_v10 = vld [vmem:[#allocation4 + $0x30] sm:$0xff] }
  0x4b   :  { %1074 = vmatprep.subr.bf16.mxu0 %v1073_v3  ;;  %v1081_v8 = vpack.c.bf16 %v85_v7, %v84_v6  ;;  %v87_v11 = vld [vmem:[#allocation4 + $0x38] sm:$0xff]  ;;  %973 = vmatprep.mubr.f32.mxu0 %v72_v9  ;;  %v88_v13 = vld [vmem:[#allocation4 + $0x40] sm:$0xff]  ;;  %v89_v14 = vld [vmem:[#allocation4 + $0x48] sm:$0xff]  ;;  %v100_v32 = vmul.f32 %v72_v9, %v72_v9 }
  0x4c   :  { %1076 = vmatpush3.bf16.msra.mxu0 %v1073_v3  ;;  %v1085_v12 = vpack.c.bf16 %v87_v11, %v86_v10  ;;  %v1089_v15 = vpack.c.bf16 %v89_v14, %v88_v13  ;;  %v90_v16 = vld [vmem:[#allocation4 + $0x50] sm:$0xff]  ;;  %v91_v17 = vld [vmem:[#allocation4 + $0x58] sm:$0xff]  ;;  %v92_v19 = vld [vmem:[#allocation4 + $0x60] sm:$0xff] }
  0x4d   :  { %1078 = vmatprep.subr.bf16.mxu0 %v1077_v5  ;;  %v1093_v18 = vpack.c.bf16 %v91_v17, %v90_v16  ;;  %v93_v20 = vld [vmem:[#allocation4 + $0x68] sm:$0xff]  ;;  %v94_v22 = vld [vmem:[#allocation4 + $0x70] sm:$0xff]  ;;  %v95_v23 = vld [vmem:[#allocation4 + $0x78] sm:$0xff] }
  0x4e   :  { %v1097_v21 = vpack.c.bf16 %v93_v20, %v92_v19  ;;  %v1101_v24 = vpack.c.bf16 %v95_v23, %v94_v22  ;;  %v73_v25 = vld [vmem:[#allocation6 + $0x8] sm:$0xff]  ;;  %v74_v26 = vld [vmem:[#allocation6 + $0x10] sm:$0xff]  ;;  %v75_v27 = vld [vmem:[#allocation6 + $0x18] sm:$0xff] }
  0x4f   :  { %v76_v28 = vld [vmem:[#allocation7] sm:$0xff]  ;;  %v77_v29 = vld [vmem:[#allocation7 + $0x8] sm:$0xff]  ;;  %v78_v30 = vld [vmem:[#allocation7 + $0x10] sm:$0xff]  ;;  %v101_v33 = vmul.f32 %v73_v25, %v73_v25  ;;  %v102_v34 = vmul.f32 %v74_v26, %v74_v26  ;;  %v103_v35 = vmul.f32 %v75_v27, %v75_v27 }
  0x50   :  { %1080 = vmatpush3.bf16.msra.mxu0 %v1077_v5  ;;  %v79_v31 = vld [vmem:[#allocation7 + $0x18] sm:$0xff]  ;;  %v104_v36 = vmul.f32 %v76_v28, %v76_v28  ;;  %v105_v37 = vmul.f32 %v77_v29, %v77_v29  ;;  %v106_v38 = vmul.f32 %v78_v30, %v78_v30  ;;  %v108_v40 = vmul.f32 %v76_v28, %v72_v9  ;;  %v1358_v44 = vld [vmem:[#allocation2] sm:$0xff]  ;;  %v97_v53 = vld [vmem:[#allocation2 + $0x8] sm:$0xff] }
  0x51   :  { %1082 = vmatprep.subr.bf16.mxu0 %v1081_v8  ;;  %v107_v39 = vmul.f32 %v79_v31, %v79_v31  ;;  %v109_v41 = vmul.f32 %v77_v29, %v73_v25  ;;  %v110_v42 = vmul.f32 %v78_v30, %v74_v26  ;;  %v111_v43 = vmul.f32 %v79_v31, %v75_v27  ;;  %v98_v55 = vld [vmem:[#allocation2 + $0x10] sm:$0xff]  ;;  %v99_v58 = vld [vmem:[#allocation2 + $0x18] sm:$0xff] }
  0x52   :  { %1011 = vmatprep.mubr.msk.f32.mxu1 %vm277_vm0, %v1358_v44 }
  0x54   :  { %1084 = vmatpush3.bf16.msra.mxu0 %v1081_v8 }
  0x55   :  { %1086 = vmatprep.subr.bf16.mxu0 %v1085_v12 }
  0x58   :  { %1088 = vmatpush3.bf16.msra.mxu0 %v1085_v12 }
  0x59   :  { %1090 = vmatprep.subr.bf16.mxu0 %v1089_v15 }
  0x5c   :  { %1092 = vmatpush3.bf16.msra.mxu0 %v1089_v15 }
  0x5d   :  { %1094 = vmatprep.subr.bf16.mxu0 %v1093_v18 }
  0x60   :  { %1096 = vmatpush3.bf16.msra.mxu0 %v1093_v18 }
  0x61   :  { %1098 = vmatprep.subr.bf16.mxu0 %v1097_v21 }
  0x64   :  { %1100 = vmatpush3.bf16.msra.mxu0 %v1097_v21 }
  0x65   :  { %1102 = vmatprep.subr.bf16.mxu0 %v1101_v24 }
  0x68   :  { %1104 = vmatpush3.bf16.msra.mxu0 %v1101_v24 }
  0x6b   :  { %974 = vmatmul.mubr.f32.vlgmr.msra.gmra.mrb[0].mxu0 %v73_v25 }
  0x6c   :  { %976 = vmatprep.mubr.f32.mxu0 %v74_v26 }
  0x6f   :  { %977 = vmatmul.mubr.f32.gmra.mrb[2].mxu0 %v75_v27 }
  0x70   :  { %979 = vmatprep.mubr.f32.mxu0 %v76_v28 }
  0x73   :  { %980 = vmatmul.mubr.f32.gmra.mrb[4].mxu0 %v77_v29 }
  0x74   :  { %982 = vmatprep.mubr.f32.mxu0 %v78_v30 }
  0x77   :  { %983 = vmatmul.mubr.f32.gmra.mrb[6].mxu0 %v79_v31 }
  0x78   :  { %985 = vmatprep.mubr.f32.mxu0 %v100_v32 }
  0x7b   :  { %986 = vmatmul.mubr.f32.gmra.mrb[8].mxu0 %v101_v33 }
  0x7c   :  { %988 = vmatprep.mubr.f32.mxu0 %v102_v34 }
  0x7f   :  { %989 = vmatmul.mubr.f32.gmra.mrb[10].mxu0 %v103_v35 }
  0x80   :  { %991 = vmatprep.mubr.f32.mxu0 %v104_v36 }
  0x83   :  { %992 = vmatmul.mubr.f32.gmra.mrb[12].mxu0 %v105_v37 }
  0x84   :  { %994 = vmatprep.mubr.f32.mxu0 %v106_v38 }
  0x87   :  { %995 = vmatmul.mubr.f32.gmra.mrb[14].mxu0 %v107_v39 }
  0x88   :  { %997 = vmatprep.mubr.f32.mxu0 %v108_v40 }
  0x8b   :  { %998 = vmatmul.mubr.f32.gmra.mrb[16].mxu0 %v109_v41 }
  0x8c   :  { %1000 = vmatprep.mubr.f32.mxu0 %v110_v42 }
  0x8f   :  { %1001 = vmatmul.mubr.f32.gmra.mrb[18].mxu0 %v111_v43 }
 0x13e   :  { %v975_v45 = vpop.f32.mrb[0].mxu0 }
 0x13f   :  { %v178_v46 = vpop.f32.mrb[1].mxu0 }
 0x140   :  { %v1105_v47 = vpack.c.bf16 %v975_v45, %v178_v46 }
 0x142   :  { %v978_v48 = vpop.f32.mrb[2].mxu0  ;;  %1106 = vmatprep.subr.bf16.mxu1 %v1105_v47 }
 0x143   :  { %v188_v49 = vpop.f32.mrb[3].mxu0  ;;  %1108 = vmatpush3.bf16.msra.mxu1 %v1105_v47 }
 0x144   :  { %v1109_v50 = vpack.c.bf16 %v978_v48, %v188_v49 }
 0x146   :  { %v981_v51 = vpop.f32.mrb[4].mxu0  ;;  %1110 = vmatprep.subr.bf16.mxu1 %v1109_v50 }
 0x147   :  { %v198_v52 = vpop.f32.mrb[5].mxu0  ;;  %1112 = vmatpush3.bf16.msra.mxu1 %v1109_v50 }
 0x148   :  { %v1113_v54 = vpack.c.bf16 %v981_v51, %v198_v52 }
 0x14a   :  { %v984_v56 = vpop.f32.mrb[6].mxu0  ;;  %1012 = vmatmul.mubr.msk.f32.vlgmr.msra.gmra.mrb[0].mxu1 %vm277_vm0, %v97_v53  ;;  %1114 = vmatprep.subr.bf16.mxu1 %v1113_v54 }
 0x14b   :  { %v208_v57 = vpop.f32.mrb[7].mxu0  ;;  %1116 = vmatpush3.bf16.msra.mxu1 %v1113_v54  ;;  %1014 = vmatprep.mubr.msk.f32.mxu1 %vm277_vm0, %v98_v55 }
 0x14c   :  { %v1117_v59 = vpack.c.bf16 %v984_v56, %v208_v57 }
 0x14e   :  { %v987_v60 = vpop.f32.mrb[8].mxu0  ;;  %1015 = vmatmul.mubr.msk.f32.gmra.mrb[2].mxu1 %vm277_vm0, %v99_v58  ;;  %1118 = vmatprep.subr.bf16.mxu1 %v1117_v59 }
 0x14f   :  { %v218_v61 = vpop.f32.mrb[9].mxu0  ;;  %1120 = vmatpush3.bf16.msra.mxu1 %v1117_v59  ;;  %1025 = vmatprep.mubr.msk.f32.mxu1 %vm277_vm0, %v1358_v44 }
 0x150   :  { %v1121_v62 = vpack.c.bf16 %v987_v60, %v218_v61 }
 0x152   :  { %v990_v63 = vpop.f32.mrb[10].mxu0  ;;  %1026 = vmatmul.mubr.msk.f32.vlgmr.msra.gmra.mrb[4].mxu1 %vm277_vm0, %v97_v53  ;;  %1122 = vmatprep.subr.bf16.mxu1 %v1121_v62 }
 0x153   :  { %v228_v0 = vpop.f32.mrb[11].mxu0  ;;  %1124 = vmatpush3.bf16.msra.mxu1 %v1121_v62  ;;  %1028 = vmatprep.mubr.msk.f32.mxu1 %vm277_vm0, %v98_v55 }
 0x154   :  { %v1125_v1 = vpack.c.bf16 %v990_v63, %v228_v0 }
 0x156   :  { %v993_v2 = vpop.f32.mrb[12].mxu0  ;;  %1029 = vmatmul.mubr.msk.f32.gmra.mrb[6].mxu1 %vm277_vm0, %v99_v58  ;;  %1126 = vmatprep.subr.bf16.mxu1 %v1125_v1 }
 0x157   :  { %v238_v3 = vpop.f32.mrb[13].mxu0  ;;  %1128 = vmatpush3.bf16.msra.mxu1 %v1125_v1  ;;  %1039 = vmatprep.mubr.msk.f32.mxu1 %vm277_vm0, %v1358_v44 }
 0x158   :  { %v1129_v4 = vpack.c.bf16 %v993_v2, %v238_v3 }
 0x15a   :  { %v996_v5 = vpop.f32.mrb[14].mxu0  ;;  %1040 = vmatmul.mubr.msk.f32.vlgmr.msra.gmra.mrb[8].mxu1 %vm277_vm0, %v97_v53  ;;  %1130 = vmatprep.subr.bf16.mxu1 %v1129_v4 }
 0x15b   :  { %v248_v6 = vpop.f32.mrb[15].mxu0  ;;  %1132 = vmatpush3.bf16.msra.mxu1 %v1129_v4  ;;  %1042 = vmatprep.mubr.msk.f32.mxu1 %vm277_vm0, %v98_v55 }
 0x15c   :  { %v1133_v7 = vpack.c.bf16 %v996_v5, %v248_v6 }
 0x15e   :  { %v999_v8 = vpop.f32.mrb[16].mxu0  ;;  %1043 = vmatmul.mubr.msk.f32.gmra.mrb[10].mxu1 %vm277_vm0, %v99_v58  ;;  %1134 = vmatprep.subr.bf16.mxu1 %v1133_v7 }
 0x15f   :  { %v258_v9 = vpop.f32.mrb[17].mxu0  ;;  %1136 = vmatpush3.bf16.msra.mxu1 %v1133_v7  ;;  %1053 = vmatprep.mubr.msk.f32.mxu1 %vm277_vm0, %v1358_v44 }
 0x160   :  { %v1137_v10 = vpack.c.bf16 %v999_v8, %v258_v9 }
 0x162   :  { %v1002_v11 = vpop.f32.mrb[18].mxu0  ;;  %1054 = vmatmul.mubr.msk.f32.vlgmr.msra.gmra.mrb[12].mxu1 %vm277_vm0, %v97_v53  ;;  %1138 = vmatprep.subr.bf16.mxu1 %v1137_v10 }
 0x163   :  { %v268_v12 = vpop.f32.mrb[19].mxu0  ;;  %1140 = vmatpush3.bf16.msra.mxu1 %v1137_v10  ;;  %1056 = vmatprep.mubr.msk.f32.mxu1 %vm277_vm0, %v98_v55 }
 0x164   :  { %v1141_v13 = vpack.c.bf16 %v1002_v11, %v268_v12 }
 0x166   :  { %1057 = vmatmul.mubr.msk.f32.gmra.mrb[14].mxu1 %vm277_vm0, %v99_v58  ;;  %1142 = vmatprep.subr.bf16.mxu1 %v1141_v13 }
 0x167   :  { %1144 = vmatpush3.bf16.msra.mxu1 %v1141_v13  ;;  %1067 = vmatprep.mubr.msk.f32.mxu1 %vm277_vm0, %v1358_v44 }
 0x16a   :  { %1068 = vmatmul.mubr.msk.f32.vlgmr.msra.gmra.mrb[16].mxu1 %vm277_vm0, %v97_v53 }
 0x16b   :  { %1070 = vmatprep.mubr.msk.f32.mxu1 %vm277_vm0, %v98_v55 }
 0x16e   :  { %1071 = vmatmul.mubr.msk.f32.gmra.mrb[18].mxu1 %vm277_vm0, %v99_v58 }
 0x21d   :  { %v1013_v14 = vpop.f32.mrb[0].mxu1 }
 0x21e   :  { %v356_v15 = vpop.f32.mrb[1].mxu1  ;;  %v716_v19 = vmul.f32 %v1013_v14, %v1013_v14 }
 0x21f   :  { %v715_v23 = vmul.f32 %v356_v15, %v356_v15 }
 0x221   :  { %v1016_v16 = vpop.f32.mrb[2].mxu1 }
 0x222   :  { %v366_v17 = vpop.f32.mrb[3].mxu1  ;;  %v718_v29 = vmul.f32 %v1016_v16, %v1016_v16 }
 0x223   :  { %v717_v33 = vmul.f32 %v366_v17, %v366_v17 }
 0x225   :  { %v1027_v18 = vpop.f32.mrb[4].mxu1 }
 0x226   :  { %v720_v20 = vmul.f32 %v1027_v18, %v1027_v18  ;;  %v724_v21 = vmul.f32 %v1027_v18, %v1013_v14  ;;  %v441_v22 = vpop.f32.mrb[5].mxu1 }
 0x227   :  { %v719_v24 = vmul.f32 %v441_v22, %v441_v22  ;;  %v723_v25 = vmul.f32 %v441_v22, %v356_v15 }
 0x228   :  { %v760_v26 = vadd.f32 %v720_v20, %v716_v19  ;;  %v740_v62 = vmul.f32 2.0, %v724_v21 }
 0x229   :  { %v759_v27 = vadd.f32 %v719_v24, %v715_v23  ;;  %v1030_v28 = vpop.f32.mrb[6].mxu1  ;;  %v739_v63 = vmul.f32 2.0, %v723_v25 }
 0x22a   :  { %v722_v30 = vmul.f32 %v1030_v28, %v1030_v28  ;;  %v726_v31 = vmul.f32 %v1030_v28, %v1016_v16  ;;  %v451_v32 = vpop.f32.mrb[7].mxu1  ;;  %v764_v53 = vadd.f32 0.0001, %v760_v26  ;;  %v744_v12 = vadd.f32 0.0001, %v740_v62 }
 0x22b   :  { %v721_v34 = vmul.f32 %v451_v32, %v451_v32  ;;  %v725_v35 = vmul.f32 %v451_v32, %v366_v17  ;;  %v763_v57 = vadd.f32 0.0001, %v759_v27  ;;  %v743_v13 = vadd.f32 0.0001, %v739_v63 }
 0x22c   :  { %v762_v36 = vadd.f32 %v722_v30, %v718_v29  ;;  %v742_v17 = vmul.f32 2.0, %v726_v31 }
 0x22d   :  { %v761_v37 = vadd.f32 %v721_v34, %v717_v33  ;;  %v1041_v38 = vpop.f32.mrb[8].mxu1  ;;  %v741_v22 = vmul.f32 2.0, %v725_v35 }
 0x22e   :  { %v728_v39 = vsub.f32 %v1041_v38, %v716_v19  ;;  %v526_v40 = vpop.f32.mrb[9].mxu1  ;;  %v766_v3 = vadd.f32 0.0001, %v762_v36  ;;  %v746_v28 = vadd.f32 0.0001, %v742_v17 }
 0x22f   :  { %v727_v41 = vsub.f32 %v526_v40, %v715_v23  ;;  %v765_v7 = vadd.f32 0.0001, %v761_v37 }
 0x231   :  { %v1044_v42 = vpop.f32.mrb[10].mxu1 }
 0x232   :  { %v730_v43 = vsub.f32 %v1044_v42, %v718_v29  ;;  %v536_v44 = vpop.f32.mrb[11].mxu1 }
 0x233   :  { %v729_v45 = vsub.f32 %v536_v44, %v717_v33  ;;  %v802_v33 = vlaneseq }
 0x235   :  { %v1055_v46 = vpop.f32.mrb[12].mxu1  ;;  %v803_v40 = vand.u32 127, %v802_v33 }
 0x236   :  { %v732_v47 = vsub.f32 %v1055_v46, %v720_v20  ;;  %v611_v48 = vpop.f32.mrb[13].mxu1 }
 0x237   :  { %v731_v49 = vsub.f32 %v611_v48, %v719_v24  ;;  %vm806_vm1 = vcmp.lt.s32.totalorder %v803_v40, 16 }
 0x238   :  { %v768_v50 = vadd.f32 %v732_v47, %v728_v39 }
 0x239   :  { %v767_v51 = vadd.f32 %v731_v49, %v727_v41  ;;  %v1058_v52 = vpop.f32.mrb[14].mxu1 }
 0x23a   :  { %v772_v54 = vadd.f32 0.0009, %v768_v50  ;;  %v734_v55 = vsub.f32 %v1058_v52, %v722_v30  ;;  %v621_v56 = vpop.f32.mrb[15].mxu1  ;;  %v745_v30 = vadd.f32 0.0001, %v741_v22 }
 0x23b   :  { %v771_v58 = vadd.f32 0.0009, %v767_v51  ;;  %v733_v59 = vsub.f32 %v621_v56, %v721_v34 }
 0x23c   :  { %v776_v60 = vmul.f32 %v772_v54, %v764_v53  ;;  %v770_v61 = vadd.f32 %v734_v55, %v730_v43 }
 0x23d   :  { %v775_v0 = vmul.f32 %v771_v58, %v763_v57  ;;  %v769_v1 = vadd.f32 %v733_v59, %v729_v45  ;;  %v1069_v2 = vpop.f32.mrb[16].mxu1 }
 0x23e   :  { %1151 = vrcp.f32 %v776_v60  ;;  %v774_v4 = vadd.f32 0.0009, %v770_v61  ;;  %v736_v5 = vsub.f32 %v1069_v2, %v724_v21  ;;  %v696_v6 = vpop.f32.mrb[17].mxu1 }
 0x23f   :  { %1153 = vrcp.f32 %v775_v0  ;;  %v773_v8 = vadd.f32 0.0009, %v769_v1  ;;  %v735_v9 = vsub.f32 %v696_v6, %v723_v25 }
 0x240   :  { %v778_v10 = vmul.f32 %v774_v4, %v766_v3  ;;  %v748_v11 = vmul.f32 2.0, %v736_v5 }
 0x241   :  { %v777_v14 = vmul.f32 %v773_v8, %v765_v7  ;;  %v747_v15 = vmul.f32 2.0, %v735_v9  ;;  %v1072_v16 = vpop.f32.mrb[18].mxu1 }
 0x242   :  { %1155 = vrcp.f32 %v778_v10  ;;  %v752_v18 = vadd.f32 0.0009, %v748_v11  ;;  %v738_v19 = vsub.f32 %v1072_v16, %v726_v31  ;;  %v706_v20 = vpop.f32.mrb[19].mxu1 }
 0x243   :  { %1157 = vrcp.f32 %v777_v14  ;;  %v751_v21 = vadd.f32 0.0009, %v747_v15  ;;  %v737_v23 = vsub.f32 %v706_v20, %v725_v35 }
 0x244   :  { %v756_v24 = vmul.f32 %v752_v18, %v744_v12  ;;  %v750_v26 = vmul.f32 2.0, %v738_v19 }
 0x245   :  { %v755_v27 = vmul.f32 %v751_v21, %v743_v13  ;;  %v749_v25 = vmul.f32 2.0, %v737_v23 }
 0x246   :  { %v754_v29 = vadd.f32 0.0009, %v750_v26 }
 0x247   :  { %v753_v32 = vadd.f32 0.0009, %v749_v25 }
 0x248   :  { %v1152_v34 = vpop.eup %1151  ;;  %v758_v36 = vmul.f32 %v754_v29, %v746_v28 }
 0x249   :  { %v1154_v37 = vpop.eup %1153  ;;  %v757_v38 = vmul.f32 %v753_v32, %v745_v30  ;;  %v784_v39 = vmul.f32 %v1152_v34, %v776_v60 }
 0x24a   :  { %v783_v31 = vmul.f32 %v1154_v37, %v775_v0 }
 0x24b   :  { %v788_v41 = vsub.f32 2.0, %v784_v39 }
 0x24c   :  { %v1156_v42 = vpop.eup %1155  ;;  %v787_v43 = vsub.f32 2.0, %v783_v31 }
 0x24d   :  { %v1158_v35 = vpop.eup %1157  ;;  %v792_v44 = vmul.f32 %v1152_v34, %v788_v41  ;;  %v786_v45 = vmul.f32 %v1156_v42, %v778_v10 }
 0x24e   :  { %v791_v46 = vmul.f32 %v1154_v37, %v787_v43  ;;  %v785_v47 = vmul.f32 %v1158_v35, %v777_v14 }
 0x24f   :  { %v796_v48 = vmul.f32 %v792_v44, %v756_v24  ;;  %v790_v49 = vsub.f32 2.0, %v786_v45 }
 0x250   :  { %v795_v50 = vmul.f32 %v791_v46, %v755_v27  ;;  %v789_v51 = vsub.f32 2.0, %v785_v47 }
 0x251   :  { %v794_v52 = vmul.f32 %v1156_v42, %v790_v49  ;;  %v810_v57 = vsel %vm806_vm1, %v796_v48, 0.0 }
 0x252   :  { %v809_v53 = vsel %vm806_vm1, %v795_v50, 0.0  ;;  %v793_v54 = vmul.f32 %v1158_v35, %v789_v51 }
 0x253   :  { %813 = vadd.xlane.f32.xlu0 %v809_v53  ;;  %v798_v55 = vmul.f32 %v794_v52, %v758_v36 }
 0x254   :  { %v797_v56 = vmul.f32 %v793_v54, %v757_v38 }
 0x255   :  { %v812_v59 = vsel %vm806_vm1, %v798_v55, 0.0 }
 0x256   :  { %v811_v58 = vsel %vm806_vm1, %v797_v56, 0.0 }
 0x257   :  { %815 = vadd.xlane.f32.xlu0 %v810_v57  ;;  %817 = vadd.xlane.f32.xlu1 %v811_v58 }
 0x25b   :  { %819 = vadd.xlane.f32.xlu1 %v812_v59 }
 0x2e0   :  { %v814_v60 = vpop.xlane.xlu0 %813 }
 0x2e4   :  { %v816_v61 = vpop.xlane.xlu0 %815  ;;  %v818_v62 = vpop.xlane.xlu1 %817 }
 0x2e5   :  { %v821_v63 = vadd.f32 %v816_v61, %v814_v60 }
 0x2e7   :  { %v822_v0 = vrot.slane %v821_v63, 4 }
 0x2e8   :  { %v820_v1 = vpop.xlane.xlu1 %819 }
 0x2e9   :  { %v823_v2 = vadd.f32 %v822_v0, %v821_v63  ;;  %v828_v3 = vadd.f32 %v820_v1, %v818_v62 }
 0x2eb   :  { %v824_v4 = vrot.slane %v823_v2, 2  ;;  %v829_v5 = vrot.slane %v828_v3, 4 }
 0x2ed   :  { %v825_v6 = vadd.f32 %v824_v4, %v823_v2  ;;  %v830_v7 = vadd.f32 %v829_v5, %v828_v3 }
 0x2ef   :  { %v826_v8 = vrot.slane %v825_v6, 1  ;;  %v831_v9 = vrot.slane %v830_v7, 2 }
 0x2f1   :  { %v827_v10 = vadd.f32 %v826_v8, %v825_v6  ;;  %v832_v11 = vadd.f32 %v831_v9, %v830_v7 }
 0x2f3   :  { %836 = vst.msk [vmem:[%s1395_s4] sm:$0x1] %vm835_vm2, %v827_v10  ;;  %v833_v12 = vrot.slane %v832_v11, 1 }
 0x2f5   :  { %v834_v13 = vadd.f32 %v833_v12, %v832_v11 }
 0x2f7   :  { %837 = vst.msk [vmem:[%s1395_s4 + $0x1] sm:$0x1] %vm835_vm2, %v834_v13 }
 0x2f8   :  { %842 = vsyncpa [#allocation3], 1 }
 0x2f9   :  { %843 = vsyncpa [#allocation5], 1 }
 0x2fa   :  { %844 = vsyncpa [#allocation8], 1 }

</bundles_post_ra>
